<compile_context>
chip_gen: v6e
topology: v6e:2x2x1
jax: 0.10.0
libtpu: 0.0.40
codegen_flags: <defaults>
</compile_context>

<pallas_src>
import jax
import jax.numpy as jnp
from jax.experimental import pallas as pl
from jax.experimental.pallas import tpu as pltpu


def _cdiv(a, b):
    return (a + b - 1) // b


def _round_up(x, m):
    return ((x + m - 1) // m) * m


def _pick_tile(size, max_tile, align):
    """Balanced tile: split `size` into cdiv(size, max_tile) near-equal,
    `align`-aligned blocks (avoids ~2x padding waste just past a multiple)."""
    size_a = max(_round_up(size, align), align)
    n_blocks = _cdiv(size_a, max_tile)
    return _round_up(_cdiv(size_a, n_blocks), align)


def _max_tiles(compute_dtype):
    """Per-generation max tile sizes, capped so the double-buffered footprint
    fits every generation's *default* scoped-VMEM budget (16 MiB on v5e,
    32 MiB on v6e/v7x)."""
    itemsize = jnp.dtype(compute_dtype).itemsize
    vmem_bytes = 128 * 1024 * 1024
    try:
        info = pltpu.get_tpu_info()
        vmem_bytes = getattr(info, "vmem_capacity_bytes", vmem_bytes)
    except Exception:
        pass
    if vmem_bytes <= 64 * 1024 * 1024:
        # v7x-like: 64 MiB physical VMEM per TensorCore -> stay modest.
        max_tm, max_tn, max_tk = 512, 512, 1024
    else:
        # v5e / v6e (128 MiB VMEM). Prefer deep K over wide N: fewer K grid
        # steps -> fewer output-block read-modify-write passes (v5e has a
        # single vector-store slot). ~13 MiB f32 double-buffered footprint.
        max_tm, max_tn, max_tk = 512, 256, 2048
    if itemsize == 2:  # bf16 inputs: half the bytes -> go deeper on K.
        max_tk *= 2
    return max_tm, max_tn, max_tk


def linear_kernel(x_ref, w_ref, b_ref, o_ref):
    """One (tm, tn) output tile of y = x @ W_packed + bias.

    x_ref: (tm, tk) activations (compute dtype)
    w_ref: (tk, tn) weight, already packed as (In, Out) (compute dtype)
    b_ref: (1, tn)  bias (f32)
    o_ref: (tm, tn) f32 output block — doubles as the accumulator; valid ONLY
           because K is the innermost ("arbitrary") grid axis and the output
           BlockSpec is K-invariant, so this block stays resident in VMEM.
    """
    k = pl.program_id(2)

    # Native (M,K)x(K,N) MXU feed with f32 accumulation.
    partial = jnp.dot(x_ref[...], w_ref[...], preferred_element_type=jnp.float32)

    @pl.when(k == 0)
    def _():
        o_ref[...] = partial

    @pl.when(k > 0)
    def _():
        o_ref[...] += partial

    @pl.when(k == pl.num_programs(2) - 1)
    def _():
        o_ref[...] += b_ref[...]


def make_simple_nn(weight, bias, *, compute_dtype=jnp.float32):
    """Build SimpleNN's forward (y = x @ weight.T + bias) from PyTorch-layout
    parameters. Parameter packing (transpose -> (In, Out), pad, cast) happens
    once here and is amortized across forward calls."""
    out_size, in_size = weight.shape
    assert bias.shape == (out_size,)

    max_tm, max_tn, max_tk = _max_tiles(compute_dtype)
    lane_align = 128
    sub_align = 16 if jnp.dtype(compute_dtype).itemsize == 2 else 8

    tn = _pick_tile(out_size, max_tn, lane_align)
    tk = _pick_tile(in_size, max_tk, lane_align)
    # Guarantee >=2 N-blocks for wide layers so v7x's second TensorCore gets
    # work even when the batch fits a single M tile (negligible on v5e/v6e).
    if _cdiv(out_size, tn) == 1 and out_size >= 512:
        tn = _round_up(_cdiv(out_size, 2), lane_align)

    n_pad = _round_up(out_size, tn)
    k_pad = _round_up(in_size, tk)
    grid_n = n_pad // tn
    grid_k = k_pad // tk

    # One-time pack: (Out, In) -> zero-padded (In_pad, Out_pad), compute dtype.
    w_packed = jnp.zeros((k_pad, n_pad), dtype=compute_dtype)
    w_packed = w_packed.at[:in_size, :out_size].set(weight.T.astype(compute_dtype))
    b_packed = jnp.zeros((1, n_pad), dtype=jnp.float32)
    b_packed = b_packed.at[0, :out_size].set(bias.astype(jnp.float32))

    itemsize = jnp.dtype(compute_dtype).itemsize

    def forward(x):
        batch, in_sz = x.shape
        assert in_sz == in_size

        tm = _pick_tile(batch, max_tm, sub_align)
        # If the whole problem is a single (M, N) tile, split M so a parallel
        # axis has >=2 blocks (v7x megacore), when big enough to amortize.
        if _cdiv(batch, tm) == 1 and grid_n == 1 and batch >= 256:
            tm = _round_up(_cdiv(batch, 2), sub_align)
        m_pad = _round_up(batch, tm)
        grid_m = m_pad // tm

        x_p = x.astype(compute_dtype)
        if (m_pad, k_pad) != (batch, in_size):
            x_p = jnp.pad(x_p, ((0, m_pad - batch), (0, k_pad - in_size)))

        cost = pl.CostEstimate(
            flops=2 * m_pad * n_pad * k_pad,
            transcendentals=0,
            # Actual streamed bytes: x re-read per N block, weight per M block.
            bytes_accessed=(itemsize * m_pad * k_pad * grid_n
                            + itemsize * k_pad * n_pad * grid_m
                            + 4 * n_pad * grid_m
                            + 4 * m_pad * n_pad),
        )

        out = pl.pallas_call(
            linear_kernel,
            out_shape=jax.ShapeDtypeStruct((m_pad, n_pad), jnp.float32),
            grid_spec=pltpu.PrefetchScalarGridSpec(
                num_scalar_prefetch=0,
                # NOTE: K must remain the LAST ("arbitrary") grid axis for the
                # in-place output accumulation in linear_kernel to be valid.
                grid=(grid_m, grid_n, grid_k),
                in_specs=[
                    pl.BlockSpec((tm, tk), lambda i, j, k: (i, k)),   # x
                    pl.BlockSpec((tk, tn), lambda i, j, k: (k, j)),   # weight (In, Out)
                    pl.BlockSpec((1, tn), lambda i, j, k: (0, j)),    # bias
                ],
                out_specs=pl.BlockSpec((tm, tn), lambda i, j, k: (i, j)),
            ),
            compiler_params=pltpu.CompilerParams(
                dimension_semantics=("parallel", "parallel", "arbitrary"),
            ),
            cost_estimate=cost,
        )(x_p, w_packed, b_packed)

        return out[:batch, :out_size]

    return forward


if __name__ == "__main__":
    key = jax.random.PRNGKey(0)
    k_x, k_w, k_b, k_x2, k_w2, k_b2 = jax.random.split(key, 6)

    # --- Toy shape matching the module spec (single grid step) ---
    batch, input_size, output_size = 8, 32, 16
    bound = 1.0 / (input_size ** 0.5)
    x = jax.random.normal(k_x, (batch, input_size), dtype=jnp.float32)
    weight = jax.random.uniform(k_w, (output_size, input_size), dtype=jnp.float32,
                                minval=-bound, maxval=bound)
    bias = jax.random.uniform(k_b, (output_size,), dtype=jnp.float32,
                              minval=-bound, maxval=bound)

    out = make_simple_nn(weight, bias)(x)
    jax.block_until_ready(out)
    ref = x @ weight.T + bias
    assert out.shape == (batch, output_size)
    assert jnp.allclose(out, ref, atol=1e-5, rtol=1e-5), "toy f32 mismatch"

    # --- Larger shape: multiple M/N/K tiles + balanced (non-pow2) batch ---
    B2, In2, Out2 = 264, 2304, 384
    bound2 = 1.0 / (In2 ** 0.5)
    x2 = jax.random.normal(k_x2, (B2, In2), dtype=jnp.float32)
    w2 = jax.random.uniform(k_w2, (Out2, In2), dtype=jnp.float32,
                            minval=-bound2, maxval=bound2)
    b2 = jax.random.uniform(k_b2, (Out2,), dtype=jnp.float32,
                            minval=-bound2, maxval=bound2)
    ref2 = x2 @ w2.T + b2

    out2 = make_simple_nn(w2, b2)(x2)
    jax.block_until_ready(out2)
    assert out2.shape == (B2, Out2)
    assert jnp.allclose(out2, ref2, atol=1e-4, rtol=1e-4), "mid f32 mismatch"

    # --- Same shape via the optional bf16-in / f32-accumulate fast path ---
    out2_bf = make_simple_nn(w2, b2, compute_dtype=jnp.bfloat16)(x2)
    jax.block_until_ready(out2_bf)
    assert out2_bf.shape == (B2, Out2)
    assert jnp.allclose(out2_bf, ref2, atol=5e-2, rtol=5e-2), "mid bf16 mismatch"

    print("KERNEL_OK")
</pallas_src>

<mosaic_0001>
module attributes {stable_mosaic.version = 11 : i64} {
  func.func @linear_kernel(%arg0: i32, %arg1: i32, %arg2: i32, %arg3: memref<8x128xf32, #tpu.memory_space<vmem>>, %arg4: memref<128x128xf32, #tpu.memory_space<vmem>>, %arg5: memref<1x128xf32, #tpu.memory_space<vmem>>, %arg6: memref<8x128xf32, #tpu.memory_space<vmem>>) attributes {dimension_semantics = [#tpu.dimension_semantics<parallel>, #tpu.dimension_semantics<parallel>, #tpu.dimension_semantics<arbitrary>], iteration_bounds = array<i64: 1, 1, 1>, scalar_prefetch = 0 : i64, scratch_operands = 0 : i64, tpu.core_type = #tpu.core_type<tc>, window_params = [{transform_indices = @transform_0, window_bounds = array<i64: 8, 128>}, {transform_indices = @transform_1, window_bounds = array<i64: 128, 128>}, {transform_indices = @transform_2, window_bounds = array<i64: 1, 128>}, {transform_indices = @transform_3, window_bounds = array<i64: 8, 128>}]} {
    %c0 = arith.constant 0 : index
    %c0_0 = arith.constant 0 : index
    %0 = vector.load %arg3[%c0, %c0_0] : memref<8x128xf32, #tpu.memory_space<vmem>>, vector<8x128xf32>
    %c0_1 = arith.constant 0 : index
    %c0_2 = arith.constant 0 : index
    %1 = vector.load %arg4[%c0_1, %c0_2] : memref<128x128xf32, #tpu.memory_space<vmem>>, vector<128x128xf32>
    %cst = arith.constant dense<0.000000e+00> : vector<8x128xf32>
    %2 = tpu.matmul %0, %1, %cst {dimension_numbers = #tpu.dot_dimension_numbers<[1], [0], [0], [1], [0, 0, 1, 1], [], []>} : vector<8x128xf32>, vector<128x128xf32>, vector<8x128xf32> -> vector<8x128xf32>
    %c0_i32 = arith.constant 0 : i32
    %3 = arith.cmpi eq, %arg2, %c0_i32 : i32
    %4 = arith.extui %3 : i1 to i32
    %c0_i32_3 = arith.constant 0 : i32
    %5 = arith.cmpi ne, %4, %c0_i32_3 : i32
    scf.if %5 {
      %c0_8 = arith.constant 0 : index
      %c0_9 = arith.constant 0 : index
      %12 = vector.load %arg6[%c0_8, %c0_9] : memref<8x128xf32, #tpu.memory_space<vmem>>, vector<8x128xf32>
      tpu.vector_store %arg6[%c0_8, %c0_9], %2 {strides = array<i32>} : memref<8x128xf32, #tpu.memory_space<vmem>>, vector<8x128xf32>,
    } else {
    }
    %c0_i32_4 = arith.constant 0 : i32
    %6 = arith.cmpi sgt, %arg2, %c0_i32_4 : i32
    %7 = arith.extui %6 : i1 to i32
    %c0_i32_5 = arith.constant 0 : i32
    %8 = arith.cmpi ne, %7, %c0_i32_5 : i32
    scf.if %8 {
      %c0_8 = arith.constant 0 : index
      %c0_9 = arith.constant 0 : index
      %12 = vector.load %arg6[%c0_8, %c0_9] : memref<8x128xf32, #tpu.memory_space<vmem>>, vector<8x128xf32>
      %13 = arith.addf %12, %2 : vector<8x128xf32>
      %c0_10 = arith.constant 0 : index
      %c0_11 = arith.constant 0 : index
      %14 = vector.load %arg6[%c0_10, %c0_11] : memref<8x128xf32, #tpu.memory_space<vmem>>, vector<8x128xf32>
      tpu.vector_store %arg6[%c0_10, %c0_11], %13 {strides = array<i32>} : memref<8x128xf32, #tpu.memory_space<vmem>>, vector<8x128xf32>,
    } else {
    }
    %c0_i32_6 = arith.constant 0 : i32
    %9 = arith.cmpi eq, %arg2, %c0_i32_6 : i32
    %10 = arith.extui %9 : i1 to i32
    %c0_i32_7 = arith.constant 0 : i32
    %11 = arith.cmpi ne, %10, %c0_i32_7 : i32
    scf.if %11 {
      %c0_8 = arith.constant 0 : index
      %c0_9 = arith.constant 0 : index
      %12 = vector.load %arg6[%c0_8, %c0_9] : memref<8x128xf32, #tpu.memory_space<vmem>>, vector<8x128xf32>
      %c0_10 = arith.constant 0 : index
      %c0_11 = arith.constant 0 : index
      %13 = vector.load %arg5[%c0_10, %c0_11] : memref<1x128xf32, #tpu.memory_space<vmem>>, vector<1x128xf32>
      %14 = vector.broadcast %13 : vector<1x128xf32> to vector<8x128xf32>
      %15 = arith.addf %12, %14 : vector<8x128xf32>
      %c0_12 = arith.constant 0 : index
      %c0_13 = arith.constant 0 : index
      %16 = vector.load %arg6[%c0_12, %c0_13] : memref<8x128xf32, #tpu.memory_space<vmem>>, vector<8x128xf32>
      tpu.vector_store %arg6[%c0_12, %c0_13], %15 {strides = array<i32>} : memref<8x128xf32, #tpu.memory_space<vmem>>, vector<8x128xf32>,
    } else {
    }
    return
  }
  func.func @transform_0(%arg0: i32, %arg1: i32, %arg2: i32) -> (i32, i32) {
    %c0_i32 = arith.constant 0 : i32
    return %arg0, %arg2 : i32, i32
  }
  func.func @transform_1(%arg0: i32, %arg1: i32, %arg2: i32) -> (i32, i32) {
    %c0_i32 = arith.constant 0 : i32
    return %arg2, %arg1 : i32, i32
  }
  func.func @transform_2(%arg0: i32, %arg1: i32, %arg2: i32) -> (i32, i32) {
    %c0_i32 = arith.constant 0 : i32
    %c0_i32_0 = arith.constant 0 : i32
    return %c0_i32, %arg1 : i32, i32
  }
  func.func @transform_3(%arg0: i32, %arg1: i32, %arg2: i32) -> (i32, i32) {
    %c0_i32 = arith.constant 0 : i32
    return %arg0, %arg1 : i32, i32
  }
}

</mosaic_0001>

<bundles_post_ra>
// kernel: tpu_custom_call.1
= control target key start
LH: loop header
LB: loop body
LE: loop exit
PB: predicated region body
PF: predicated region fallthrough
CT: control target
= control target key end

     0   :  { %8 = vsyncpa [#allocation3], 0  ;;  %s334_s0 = inlined_call_operand.hbm [shape: f32[8,128], index: 0, kind: input, shape index: {}]   ;;  %s335_s1 = inlined_call_operand.hbm [shape: f32[128,128], index: 1, kind: input, shape index: {}]   ;;  %s336_s2 = inlined_call_operand.vmem [shape: f32[1,128], index: 2, kind: input, shape index: {}]   ;;  %s337_s3 = inlined_call_operand.hbm [shape: f32[8,128], index: 3, kind: output, shape index: {}]  }
   0x1   :  { %9 = vsyncpa [#allocation6], 0 }
   0x2   :  { %10 = vsyncpa [#allocation4], 0  ;;  %s295_s12 = smov [#allocation2]   ;;  %s296_s14 = smov [#allocation5]  }
   0x3   :  { %s17_s13 = sshll.u32 %s295_s12, 4  ;;  %s26_s15 = sshll.u32 %s296_s14, 4  ;;  %s18_s13 = int_to_ptr.vmem [resolvable:$true] %s17_s13  ;;  %s27_s15 = int_to_ptr.vmem [resolvable:$true] %s26_s15 }
   0x4   :  { %s237_s16 = scalar_lea.vmem %s18_s13, 128  ;;  %p242_p1 = scmp.lt.s32.totalorder %s18_s13, %s18_s13 }
   0x5   :  { %p238_p0 = scmp.ne.s32.totalorder %s18_s13, %s237_s16  ;;  %p243_p2 = scmp.lt.s32.totalorder %s237_s16, %s237_s16 }
   0x7   :  { %p244_p3 = por %p243_p2, %p242_p1 }
   0x9   :  { %p245_p4 = pnand %p244_p3, %p238_p0 }
   0xb   :  { %248 = shalt.err (!%p245_p4)
}
   0xc   :  { %20 = dma.hbm_to_vmem [thread:$0]  %s334_s0, 128, %s18_s13, [#allocation3]  }
   0xd   :  { %s257_s19 = scalar_lea.vmem %s27_s15, 2048  ;;  %p262_p6 = scmp.lt.s32.totalorder %s27_s15, %s27_s15 }
   0xe   :  { %p258_p5 = scmp.ne.s32.totalorder %s27_s15, %s257_s19  ;;  %p263_p7 = scmp.lt.s32.totalorder %s257_s19, %s257_s19 }
  0x10   :  { %p264_p8 = por %p263_p7, %p262_p6 }
  0x12   :  { %p265_p9 = pnand %p264_p8, %p258_p5 }
  0x14   :  { %268 = shalt.err (!%p265_p9)
}
  0x15   :  { %s297_s20 = smov 128   ;;  %s298_s21 = smov 8  }
  0x16   :  { %32 = dma.hbm_to_vmem [thread:$0]  %s335_s1, 2048, %s27_s15, [#allocation6], %s297_s20, %s297_s20, %s298_s21  }
  0x17   :  { %289 = dma.done.wait [#allocation3], 128  }
  0x18   :  { %290 = vsyncadd [#allocation3], 4294967168 }
  0x19   :  { %291 = dma.done.wait [#allocation6], 2048  }
  0x1a   :  { %292 = vsyncadd [#allocation6], 4294965248  ;;  %v299_v0 = vmov 0.0   ;;  %vm300_vm0 = vmmov 0   ;;  %v57_v1 = vld [vmem:[#allocation5 + $0x78] sm:$0xff]  ;;  %v56_v2 = vld [vmem:[#allocation5 + $0x70] sm:$0xff] }
  0x1b   :  { %187 = vmatprep.subr.mxu0 %v299_v0  ;;  %219 = vmatprep.mubr.msk.f32.mxu0 %vm300_vm0, %v299_v0  ;;  %v55_v3 = vld [vmem:[#allocation5 + $0x68] sm:$0xff]  ;;  %v54_v4 = vld [vmem:[#allocation5 + $0x60] sm:$0xff]  ;;  %v53_v5 = vld [vmem:[#allocation5 + $0x58] sm:$0xff]  ;;  %s301_s24 = smov [#allocation7]  }
  0x1c   :  { %188 = vmatpush3.msra.mxu0 %v57_v1  ;;  %v52_v6 = vld [vmem:[#allocation5 + $0x50] sm:$0xff]  ;;  %v51_v7 = vld [vmem:[#allocation5 + $0x48] sm:$0xff]  ;;  %v50_v8 = vld [vmem:[#allocation5 + $0x40] sm:$0xff]  ;;  %s159_s25 = sshll.u32 %s301_s24, 4  ;;  %s160_s25 = int_to_ptr.vmem [resolvable:$true] %s159_s25 }
  0x1d   :  { %189 = vmatprep.subr.mxu0 %v299_v0  ;;  %v49_v9 = vld [vmem:[#allocation5 + $0x38] sm:$0xff]  ;;  %v48_v10 = vld [vmem:[#allocation5 + $0x30] sm:$0xff]  ;;  %v47_v11 = vld [vmem:[#allocation5 + $0x28] sm:$0xff]  ;;  %s269_s26 = scalar_lea.vmem %s160_s25, 128  ;;  %p274_p11 = scmp.lt.s32.totalorder %s160_s25, %s160_s25 }
  0x1e   :  { %190 = vmatpush3.msra.mxu0 %v56_v2  ;;  %v46_v12 = vld [vmem:[#allocation5 + $0x20] sm:$0xff]  ;;  %v45_v13 = vld [vmem:[#allocation5 + $0x18] sm:$0xff]  ;;  %v44_v14 = vld [vmem:[#allocation5 + $0x10] sm:$0xff]  ;;  %p270_p10 = scmp.ne.s32.totalorder %s160_s25, %s269_s26  ;;  %p275_p12 = scmp.lt.s32.totalorder %s269_s26, %s269_s26 }
  0x1f   :  { %191 = vmatprep.subr.mxu0 %v299_v0  ;;  %v43_v15 = vld [vmem:[#allocation5 + $0x8] sm:$0xff]  ;;  %v42_v16 = vld [vmem:[#allocation5] sm:$0xff]  ;;  %v41_v17 = vld [vmem:[#allocation2] sm:$0xff] }
  0x20   :  { %192 = vmatpush3.msra.mxu0 %v55_v3  ;;  %v169_v18 = vld [vmem:[%s336_s2] ss:$0 sm:$0xff]  ;;  %p276_p13 = por %p275_p12, %p274_p11 }
  0x21   :  { %193 = vmatprep.subr.mxu0 %v299_v0 }
  0x22   :  { %194 = vmatpush3.msra.mxu0 %v54_v4  ;;  %p277_p0 = pnand %p276_p13, %p270_p10 }
  0x23   :  { %195 = vmatprep.subr.mxu0 %v299_v0 }
  0x24   :  { %196 = vmatpush3.msra.mxu0 %v53_v5 }
  0x25   :  { %197 = vmatprep.subr.mxu0 %v299_v0 }
  0x26   :  { %198 = vmatpush3.msra.mxu0 %v52_v6 }
  0x27   :  { %199 = vmatprep.subr.mxu0 %v299_v0 }
  0x28   :  { %200 = vmatpush3.msra.mxu0 %v51_v7 }
  0x29   :  { %201 = vmatprep.subr.mxu0 %v299_v0 }
  0x2a   :  { %202 = vmatpush3.msra.mxu0 %v50_v8 }
  0x2b   :  { %203 = vmatprep.subr.mxu0 %v299_v0 }
  0x2c   :  { %204 = vmatpush3.msra.mxu0 %v49_v9 }
  0x2d   :  { %205 = vmatprep.subr.mxu0 %v299_v0 }
  0x2e   :  { %206 = vmatpush3.msra.mxu0 %v48_v10 }
  0x2f   :  { %207 = vmatprep.subr.mxu0 %v299_v0 }
  0x30   :  { %208 = vmatpush3.msra.mxu0 %v47_v11 }
  0x31   :  { %209 = vmatprep.subr.mxu0 %v299_v0 }
  0x32   :  { %210 = vmatpush3.msra.mxu0 %v46_v12 }
  0x33   :  { %211 = vmatprep.subr.mxu0 %v299_v0 }
  0x34   :  { %212 = vmatpush3.msra.mxu0 %v45_v13 }
  0x35   :  { %213 = vmatprep.subr.mxu0 %v299_v0 }
  0x36   :  { %214 = vmatpush3.msra.mxu0 %v44_v14 }
  0x37   :  { %215 = vmatprep.subr.mxu0 %v299_v0 }
  0x38   :  { %216 = vmatpush3.msra.mxu0 %v43_v15 }
  0x39   :  { %217 = vmatprep.subr.mxu0 %v299_v0 }
  0x3a   :  { %218 = vmatpush3.msra.mxu0 %v42_v16 }
  0x3b   :  { %220 = vmatmul.mubr.f32.vlgmr.msra.gmra.mxu0 %v41_v17 }
  0xfb   :  { %v124_v19 = vpop.f32.mrf.mxu0 }
  0xfc   :  { %v151_v20 = vadd.f32 %v169_v18, %v124_v19 }
  0xfd   :  { %v221_v21 = vpop.f32.mrf.mxu0 }
  0xfe   :  { %152 = vst [vmem:[#allocation7] sm:$0xff] %v151_v20 }
  0xff   :  { %280 = shalt.err (!%p277_p0)
}
 0x100   :  { %162 = dma.vmem_to_hbm [thread:$0]  %s160_s25, 128, %s337_s3, [#allocation4]  }
 0x101   :  { %293 = dma.done.wait [#allocation4], 128  }
 0x102   :  { %294 = vsyncadd [#allocation4], 4294967168 }
 0x103   :  { %166 = vsyncpa [#allocation3], 1 }
 0x104   :  { %167 = vsyncpa [#allocation6], 1 }
 0x105   :  { %168 = vsyncpa [#allocation4], 1 }

</bundles_post_ra>
